<compile_context>
chip_gen: v7x
topology: tpu7x:2x2x1
jax: 0.10.0
libtpu: 0.0.40
codegen_flags: <defaults>
</compile_context>

<pallas_src>
import jax
import jax.numpy as jnp
from jax.experimental import pallas as pl
from jax.experimental.pallas import tpu as pltpu

EPS = 1e-5
LAYER_SIZES = [256, 128, 64, 32]   # hidden widths carrying BN + ReLU
OUT_CLASSES = 3
OUT_PAD = 128                      # class lanes padded to a full 128-lane vreg
NEG_BIG = -1e30                    # finite "minus infinity" for padded logits


def mlp_kernel(x_ref,
               w1_ref, t1_ref,
               w2_ref, t2_ref,
               w3_ref, t3_ref,
               w4_ref, t4_ref,
               w5_ref, b5_ref,
               out_ref):
    """One TILE_B-row slab of the batch; all weights are VMEM-resident."""

    def hidden(h, w_ref, t_ref):
        # Linear (BN scale pre-folded into W, Linear bias + BN shift folded
        # into t) followed by ReLU.  bf16 MXU inputs, f32 accumulation.
        y = jnp.dot(h.astype(jnp.bfloat16), w_ref[...],
                    preferred_element_type=jnp.float32)
        return jnp.maximum(y + t_ref[...], 0.0)
        # NOTE: Dropout layers are identity at inference time.

    h = x_ref[...]                       # (TILE_B, in_dim) f32, cast on-chip
    h = hidden(h, w1_ref, t1_ref)
    h = hidden(h, w2_ref, t2_ref)
    h = hidden(h, w3_ref, t3_ref)
    h = hidden(h, w4_ref, t4_ref)

    logits = jnp.dot(h.astype(jnp.bfloat16), w5_ref[...],
                     preferred_element_type=jnp.float32) + b5_ref[...]

    # Softmax over the (lane-dense, padded) class axis in f32.  Padded lanes
    # carry logit ~ -1e30, so exp underflows to exactly 0 and the real-class
    # probabilities are unchanged.  Exact divide -> rows sum to 1.
    m = jnp.max(logits, axis=-1, keepdims=True)
    e = jnp.exp(logits - m)
    denom = jnp.sum(e, axis=-1, keepdims=True)
    out_ref[...] = e / denom


def init_params(key, input_size):
    """Deterministic PyTorch-style init for Linear + BatchNorm1d parameters."""
    dims = [input_size] + LAYER_SIZES + [OUT_CLASSES]
    params = []
    for i in range(len(dims) - 1):
        fan_in, fan_out = dims[i], dims[i + 1]
        key, kw, kb, kg, kbe, km, kv = jax.random.split(key, 7)
        bound = 1.0 / jnp.sqrt(fan_in)
        w = jax.random.uniform(kw, (fan_in, fan_out), jnp.float32, -bound, bound)
        b = jax.random.uniform(kb, (fan_out,), jnp.float32, -bound, bound)
        if i < len(LAYER_SIZES):   # hidden layers carry a BatchNorm1d
            gamma = 1.0 + 0.1 * jax.random.normal(kg, (fan_out,), jnp.float32)
            beta = 0.1 * jax.random.normal(kbe, (fan_out,), jnp.float32)
            run_mean = 0.1 * jax.random.normal(km, (fan_out,), jnp.float32)
            run_var = jnp.abs(1.0 + 0.1 * jax.random.normal(kv, (fan_out,), jnp.float32))
            params.append((w, b, gamma, beta, run_mean, run_var))
        else:
            params.append((w, b))
    return params


def fold_bn(params):
    """Fold BN scale into W columns (bf16) and bias+BN shift into one f32 row.

    The final layer's class dim is padded 3 -> 128: zero weight columns plus a
    large-negative bias so padded logits exp to exactly 0 in the softmax.
    """
    folded = []
    for (w, b, gamma, beta, mean, var) in params[:-1]:
        scale = gamma / jnp.sqrt(var + EPS)                 # fold in f32
        w_f = (w * scale[None, :]).astype(jnp.bfloat16)     # cast only at the end
        shift = ((b - mean) * scale + beta).reshape(1, -1).astype(jnp.float32)
        folded.append((w_f, shift))
    w5, b5 = params[-1]
    w5p = jnp.zeros((w5.shape[0], OUT_PAD), jnp.float32).at[:, :OUT_CLASSES].set(w5)
    b5p = jnp.full((1, OUT_PAD), NEG_BIG, jnp.float32).at[0, :OUT_CLASSES].set(b5)
    return folded, w5p.astype(jnp.bfloat16), b5p


def _round_up(n, m):
    return ((n + m - 1) // m) * m


def your_model_forward(x, params, tile_b=1024):
    """x: (B, input_size) f32.  Returns (B, 3) f32 softmax probabilities."""
    B, in_dim = x.shape
    folded, w5, b5 = fold_bn(params)

    # Batch tile: multiple of 8 (sublane), and at most half of the 8-aligned
    # batch so the 1-D "parallel" grid has >= 2 steps (keeps both v7x TCs busy).
    tile_b = max(8, _round_up(tile_b, 8))
    b_ceil = _round_up(B, 8)
    if b_ceil >= 16:
        tile_b = min(tile_b, _round_up((b_ceil + 1) // 2, 8))
    else:
        tile_b = min(tile_b, b_ceil)
    b_pad = _round_up(B, tile_b)

    # Stream x as f32; the kernel casts to bf16 in VMEM (no extra HBM pass).
    x_p = x if b_pad == B else jnp.pad(x, ((0, b_pad - B), (0, 0)))

    const_map = lambda i: (0, 0)          # weights: same block every grid step
    flat_args = [x_p]
    in_specs = [pl.BlockSpec((tile_b, in_dim), lambda i: (i, 0))]
    weight_bytes = 0
    for w, t in folded:
        flat_args += [w, t]
        in_specs += [pl.BlockSpec(w.shape, const_map),
                     pl.BlockSpec(t.shape, const_map)]
        weight_bytes += w.size * 2 + t.size * 4
    flat_args += [w5, b5]
    in_specs += [pl.BlockSpec(w5.shape, const_map),
                 pl.BlockSpec(b5.shape, const_map)]
    weight_bytes += w5.size * 2 + b5.size * 4

    # Advisory cost estimate (helps XLA schedule around the call).
    dims = [in_dim] + LAYER_SIZES + [OUT_PAD]
    macs_per_row = sum(dims[i] * dims[i + 1] for i in range(len(dims) - 1))
    cost = pl.CostEstimate(
        flops=int(2 * b_pad * macs_per_row),
        transcendentals=int(b_pad * OUT_PAD),
        bytes_accessed=int(b_pad * in_dim * 4 + b_pad * OUT_PAD * 4 + weight_bytes))

    # Rough per-step VMEM footprint: double-buffered x/out slabs, resident
    # weights, f32 intermediates (+bf16 copies).  Raise the scoped limit only
    # when it would exceed the 32 MiB default (v5e default is even lower).
    act_cols = sum(LAYER_SIZES) + OUT_PAD
    step_bytes = (2 * tile_b * in_dim * 4
                  + 2 * tile_b * OUT_PAD * 4
                  + weight_bytes
                  + 2 * tile_b * act_cols * 4)
    vmem_limit = None
    if step_bytes > 32 * 1024 * 1024:
        vmem_limit = int(min(step_bytes, 64 * 1024 * 1024))

    out = pl.pallas_call(
        mlp_kernel,
        out_shape=jax.ShapeDtypeStruct((b_pad, OUT_PAD), jnp.float32),
        grid=(b_pad // tile_b,),
        in_specs=in_specs,
        out_specs=pl.BlockSpec((tile_b, OUT_PAD), lambda i: (i, 0)),
        compiler_params=pltpu.CompilerParams(
            dimension_semantics=("parallel",),       # megacore sharding on v7x
            vmem_limit_bytes=vmem_limit),
        cost_estimate=cost,
    )(*flat_args)
    return out[:B, :OUT_CLASSES]


def reference_forward(x, params):
    """Pure-JAX f32 reference with identical (eval-mode) semantics."""
    h = x
    for (w, b, gamma, beta, mean, var) in params[:-1]:
        h = h @ w + b
        h = (h - mean) / jnp.sqrt(var + EPS) * gamma + beta
        h = jnp.maximum(h, 0.0)
    w5, b5 = params[-1]
    logits = h @ w5 + b5
    return jax.nn.softmax(logits, axis=1)


if __name__ == "__main__":
    key = jax.random.PRNGKey(0)
    k_x, k_p = jax.random.split(key)

    input_size = 32
    batch = 16
    x = jax.random.normal(k_x, (batch, input_size), jnp.float32)
    params = init_params(k_p, input_size)

    # tile_b=8 at this small batch exercises a 2-step grid with resident weights.
    out = your_model_forward(x, params, tile_b=8)
    out = jax.block_until_ready(out)

    ref = reference_forward(x, params)
    assert out.shape == (batch, OUT_CLASSES)
    assert bool(jnp.all(jnp.isfinite(out)))
    # bf16 MXU inputs (f32 accumulation) -> loosened tolerance vs f32 reference.
    assert bool(jnp.allclose(out, ref, atol=2e-2, rtol=5e-2))
    # Exact softmax normalization -> rows sum to 1 within float precision.
    assert bool(jnp.allclose(jnp.sum(out, axis=1), 1.0, atol=1e-3))

    print("KERNEL_OK")
</pallas_src>

<mosaic_0001>
module attributes {stable_mosaic.version = 11 : i64} {
  func.func @mlp_kernel(%arg0: i32, %arg1: memref<8x32xf32, #tpu.memory_space<vmem>>, %arg2: memref<32x256xbf16, #tpu.memory_space<vmem>>, %arg3: memref<1x256xf32, #tpu.memory_space<vmem>>, %arg4: memref<256x128xbf16, #tpu.memory_space<vmem>>, %arg5: memref<1x128xf32, #tpu.memory_space<vmem>>, %arg6: memref<128x64xbf16, #tpu.memory_space<vmem>>, %arg7: memref<1x64xf32, #tpu.memory_space<vmem>>, %arg8: memref<64x32xbf16, #tpu.memory_space<vmem>>, %arg9: memref<1x32xf32, #tpu.memory_space<vmem>>, %arg10: memref<32x128xbf16, #tpu.memory_space<vmem>>, %arg11: memref<1x128xf32, #tpu.memory_space<vmem>>, %arg12: memref<8x128xf32, #tpu.memory_space<vmem>>) attributes {dimension_semantics = [#tpu.dimension_semantics<parallel>], iteration_bounds = array<i64: 2>, scalar_prefetch = 0 : i64, scratch_operands = 0 : i64, tpu.core_type = #tpu.core_type<tc>, window_params = [{transform_indices = @transform_0, window_bounds = array<i64: 8, 32>}, {pipeline_mode = #tpu.pipeline_mode<synchronous>, transform_indices = @transform_1, window_bounds = array<i64: 32, 256>}, {pipeline_mode = #tpu.pipeline_mode<synchronous>, transform_indices = @transform_2, window_bounds = array<i64: 1, 256>}, {pipeline_mode = #tpu.pipeline_mode<synchronous>, transform_indices = @transform_3, window_bounds = array<i64: 256, 128>}, {pipeline_mode = #tpu.pipeline_mode<synchronous>, transform_indices = @transform_4, window_bounds = array<i64: 1, 128>}, {pipeline_mode = #tpu.pipeline_mode<synchronous>, transform_indices = @transform_5, window_bounds = array<i64: 128, 64>}, {pipeline_mode = #tpu.pipeline_mode<synchronous>, transform_indices = @transform_6, window_bounds = array<i64: 1, 64>}, {pipeline_mode = #tpu.pipeline_mode<synchronous>, transform_indices = @transform_7, window_bounds = array<i64: 64, 32>}, {pipeline_mode = #tpu.pipeline_mode<synchronous>, transform_indices = @transform_8, window_bounds = array<i64: 1, 32>}, {pipeline_mode = #tpu.pipeline_mode<synchronous>, transform_indices = @transform_9, window_bounds = array<i64: 32, 128>}, {pipeline_mode = #tpu.pipeline_mode<synchronous>, transform_indices = @transform_10, window_bounds = array<i64: 1, 128>}, {transform_indices = @transform_11, window_bounds = array<i64: 8, 128>}]} {
    %c0 = arith.constant 0 : index
    %c0_0 = arith.constant 0 : index
    %0 = vector.load %arg1[%c0, %c0_0] : memref<8x32xf32, #tpu.memory_space<vmem>>, vector<8x32xf32>
    %1 = arith.truncf %0 : vector<8x32xf32> to vector<8x32xbf16>
    %c0_1 = arith.constant 0 : index
    %c0_2 = arith.constant 0 : index
    %2 = vector.load %arg2[%c0_1, %c0_2] : memref<32x256xbf16, #tpu.memory_space<vmem>>, vector<32x256xbf16>
    %cst = arith.constant dense<0.000000e+00> : vector<8x256xf32>
    %3 = tpu.matmul %1, %2, %cst {dimension_numbers = #tpu.dot_dimension_numbers<[1], [0], [0], [1], [0, 0, 1, 1], [], []>} : vector<8x32xbf16>, vector<32x256xbf16>, vector<8x256xf32> -> vector<8x256xf32>
    %c0_3 = arith.constant 0 : index
    %c0_4 = arith.constant 0 : index
    %4 = vector.load %arg3[%c0_3, %c0_4] : memref<1x256xf32, #tpu.memory_space<vmem>>, vector<1x256xf32>
    %5 = vector.broadcast %4 : vector<1x256xf32> to vector<8x256xf32>
    %6 = arith.addf %3, %5 : vector<8x256xf32>
    %cst_5 = arith.constant 0.000000e+00 : f32
    %7 = vector.broadcast %cst_5 : f32 to vector<8x256xf32>
    %8 = arith.maximumf %6, %7 : vector<8x256xf32>
    %9 = arith.truncf %8 : vector<8x256xf32> to vector<8x256xbf16>
    %c0_6 = arith.constant 0 : index
    %c0_7 = arith.constant 0 : index
    %10 = vector.load %arg4[%c0_6, %c0_7] : memref<256x128xbf16, #tpu.memory_space<vmem>>, vector<256x128xbf16>
    %cst_8 = arith.constant dense<0.000000e+00> : vector<8x128xf32>
    %11 = tpu.matmul %9, %10, %cst_8 {dimension_numbers = #tpu.dot_dimension_numbers<[1], [0], [0], [1], [0, 0, 1, 1], [], []>} : vector<8x256xbf16>, vector<256x128xbf16>, vector<8x128xf32> -> vector<8x128xf32>
    %c0_9 = arith.constant 0 : index
    %c0_10 = arith.constant 0 : index
    %12 = vector.load %arg5[%c0_9, %c0_10] : memref<1x128xf32, #tpu.memory_space<vmem>>, vector<1x128xf32>
    %13 = vector.broadcast %12 : vector<1x128xf32> to vector<8x128xf32>
    %14 = arith.addf %11, %13 : vector<8x128xf32>
    %cst_11 = arith.constant 0.000000e+00 : f32
    %15 = vector.broadcast %cst_11 : f32 to vector<8x128xf32>
    %16 = arith.maximumf %14, %15 : vector<8x128xf32>
    %17 = arith.truncf %16 : vector<8x128xf32> to vector<8x128xbf16>
    %c0_12 = arith.constant 0 : index
    %c0_13 = arith.constant 0 : index
    %18 = vector.load %arg6[%c0_12, %c0_13] : memref<128x64xbf16, #tpu.memory_space<vmem>>, vector<128x64xbf16>
    %cst_14 = arith.constant dense<0.000000e+00> : vector<8x64xf32>
    %19 = tpu.matmul %17, %18, %cst_14 {dimension_numbers = #tpu.dot_dimension_numbers<[1], [0], [0], [1], [0, 0, 1, 1], [], []>} : vector<8x128xbf16>, vector<128x64xbf16>, vector<8x64xf32> -> vector<8x64xf32>
    %c0_15 = arith.constant 0 : index
    %c0_16 = arith.constant 0 : index
    %20 = vector.load %arg7[%c0_15, %c0_16] : memref<1x64xf32, #tpu.memory_space<vmem>>, vector<1x64xf32>
    %21 = vector.broadcast %20 : vector<1x64xf32> to vector<8x64xf32>
    %22 = arith.addf %19, %21 : vector<8x64xf32>
    %cst_17 = arith.constant 0.000000e+00 : f32
    %23 = vector.broadcast %cst_17 : f32 to vector<8x64xf32>
    %24 = arith.maximumf %22, %23 : vector<8x64xf32>
    %25 = arith.truncf %24 : vector<8x64xf32> to vector<8x64xbf16>
    %c0_18 = arith.constant 0 : index
    %c0_19 = arith.constant 0 : index
    %26 = vector.load %arg8[%c0_18, %c0_19] : memref<64x32xbf16, #tpu.memory_space<vmem>>, vector<64x32xbf16>
    %cst_20 = arith.constant dense<0.000000e+00> : vector<8x32xf32>
    %27 = tpu.matmul %25, %26, %cst_20 {dimension_numbers = #tpu.dot_dimension_numbers<[1], [0], [0], [1], [0, 0, 1, 1], [], []>} : vector<8x64xbf16>, vector<64x32xbf16>, vector<8x32xf32> -> vector<8x32xf32>
    %c0_21 = arith.constant 0 : index
    %c0_22 = arith.constant 0 : index
    %28 = vector.load %arg9[%c0_21, %c0_22] : memref<1x32xf32, #tpu.memory_space<vmem>>, vector<1x32xf32>
    %29 = vector.broadcast %28 : vector<1x32xf32> to vector<8x32xf32>
    %30 = arith.addf %27, %29 : vector<8x32xf32>
    %cst_23 = arith.constant 0.000000e+00 : f32
    %31 = vector.broadcast %cst_23 : f32 to vector<8x32xf32>
    %32 = arith.maximumf %30, %31 : vector<8x32xf32>
    %33 = arith.truncf %32 : vector<8x32xf32> to vector<8x32xbf16>
    %c0_24 = arith.constant 0 : index
    %c0_25 = arith.constant 0 : index
    %34 = vector.load %arg10[%c0_24, %c0_25] : memref<32x128xbf16, #tpu.memory_space<vmem>>, vector<32x128xbf16>
    %cst_26 = arith.constant dense<0.000000e+00> : vector<8x128xf32>
    %35 = tpu.matmul %33, %34, %cst_26 {dimension_numbers = #tpu.dot_dimension_numbers<[1], [0], [0], [1], [0, 0, 1, 1], [], []>} : vector<8x32xbf16>, vector<32x128xbf16>, vector<8x128xf32> -> vector<8x128xf32>
    %c0_27 = arith.constant 0 : index
    %c0_28 = arith.constant 0 : index
    %36 = vector.load %arg11[%c0_27, %c0_28] : memref<1x128xf32, #tpu.memory_space<vmem>>, vector<1x128xf32>
    %37 = vector.broadcast %36 : vector<1x128xf32> to vector<8x128xf32>
    %38 = arith.addf %35, %37 : vector<8x128xf32>
    %cst_29 = arith.constant dense<0xFF800000> : vector<8xf32>
    %39 = vector.multi_reduction <maximumf>, %38, %cst_29 [1] : vector<8x128xf32> to vector<8xf32>
    %40 = vector.shape_cast %39 : vector<8xf32> to vector<8x1xf32>
    %41 = vector.broadcast %40 : vector<8x1xf32> to vector<8x128xf32>
    %42 = arith.subf %38, %41 : vector<8x128xf32>
    %43 = math.exp %42 : vector<8x128xf32>
    %cst_30 = arith.constant dense<0.000000e+00> : vector<8xf32>
    %44 = vector.multi_reduction <add>, %43, %cst_30 [1] : vector<8x128xf32> to vector<8xf32>
    %45 = vector.shape_cast %44 : vector<8xf32> to vector<8x1xf32>
    %46 = vector.broadcast %45 : vector<8x1xf32> to vector<8x128xf32>
    %47 = arith.divf %43, %46 : vector<8x128xf32>
    %c0_31 = arith.constant 0 : index
    %c0_32 = arith.constant 0 : index
    %48 = vector.load %arg12[%c0_31, %c0_32] : memref<8x128xf32, #tpu.memory_space<vmem>>, vector<8x128xf32>
    tpu.vector_store %arg12[%c0_31, %c0_32], %47 {strides = array<i32>} : memref<8x128xf32, #tpu.memory_space<vmem>>, vector<8x128xf32>,
    return
  }
  func.func @transform_0(%arg0: i32) -> (i32, i32) {
    %c0_i32 = arith.constant 0 : i32
    %c0_i32_0 = arith.constant 0 : i32
    return %arg0, %c0_i32 : i32, i32
  }
  func.func @transform_1(%arg0: i32) -> (i32, i32) {
    %c0_i32 = arith.constant 0 : i32
    %c0_i32_0 = arith.constant 0 : i32
    %c0_i32_1 = arith.constant 0 : i32
    return %c0_i32, %c0_i32_0 : i32, i32
  }
  func.func @transform_2(%arg0: i32) -> (i32, i32) {
    %c0_i32 = arith.constant 0 : i32
    %c0_i32_0 = arith.constant 0 : i32
    %c0_i32_1 = arith.constant 0 : i32
    return %c0_i32, %c0_i32_0 : i32, i32
  }
  func.func @transform_3(%arg0: i32) -> (i32, i32) {
    %c0_i32 = arith.constant 0 : i32
    %c0_i32_0 = arith.constant 0 : i32
    %c0_i32_1 = arith.constant 0 : i32
    return %c0_i32, %c0_i32_0 : i32, i32
  }
  func.func @transform_4(%arg0: i32) -> (i32, i32) {
    %c0_i32 = arith.constant 0 : i32
    %c0_i32_0 = arith.constant 0 : i32
    %c0_i32_1 = arith.constant 0 : i32
    return %c0_i32, %c0_i32_0 : i32, i32
  }
  func.func @transform_5(%arg0: i32) -> (i32, i32) {
    %c0_i32 = arith.constant 0 : i32
    %c0_i32_0 = arith.constant 0 : i32
    %c0_i32_1 = arith.constant 0 : i32
    return %c0_i32, %c0_i32_0 : i32, i32
  }
  func.func @transform_6(%arg0: i32) -> (i32, i32) {
    %c0_i32 = arith.constant 0 : i32
    %c0_i32_0 = arith.constant 0 : i32
    %c0_i32_1 = arith.constant 0 : i32
    return %c0_i32, %c0_i32_0 : i32, i32
  }
  func.func @transform_7(%arg0: i32) -> (i32, i32) {
    %c0_i32 = arith.constant 0 : i32
    %c0_i32_0 = arith.constant 0 : i32
    %c0_i32_1 = arith.constant 0 : i32
    return %c0_i32, %c0_i32_0 : i32, i32
  }
  func.func @transform_8(%arg0: i32) -> (i32, i32) {
    %c0_i32 = arith.constant 0 : i32
    %c0_i32_0 = arith.constant 0 : i32
    %c0_i32_1 = arith.constant 0 : i32
    return %c0_i32, %c0_i32_0 : i32, i32
  }
  func.func @transform_9(%arg0: i32) -> (i32, i32) {
    %c0_i32 = arith.constant 0 : i32
    %c0_i32_0 = arith.constant 0 : i32
    %c0_i32_1 = arith.constant 0 : i32
    return %c0_i32, %c0_i32_0 : i32, i32
  }
  func.func @transform_10(%arg0: i32) -> (i32, i32) {
    %c0_i32 = arith.constant 0 : i32
    %c0_i32_0 = arith.constant 0 : i32
    %c0_i32_1 = arith.constant 0 : i32
    return %c0_i32, %c0_i32_0 : i32, i32
  }
  func.func @transform_11(%arg0: i32) -> (i32, i32) {
    %c0_i32 = arith.constant 0 : i32
    %c0_i32_0 = arith.constant 0 : i32
    return %arg0, %c0_i32 : i32, i32
  }
}

</mosaic_0001>

<bundles_post_ra>
// kernel: tpu_custom_call.1
= control target key start
LH: loop header
LB: loop body
LE: loop exit
PB: predicated region body
PF: predicated region fallthrough
CT: control target
= control target key end

     0   :  { %s2080_s0 = inlined_call_operand.hbm [shape: f32[16,32], index: 0, kind: input, shape index: {}]   ;;  %s2081_s1 = inlined_call_operand.hbm [shape: bf16[32,256], index: 1, kind: input, shape index: {}]   ;;  %s2082_s2 = inlined_call_operand.vmem [shape: f32[1,256], index: 2, kind: input, shape index: {}]   ;;  %s2083_s3 = inlined_call_operand.vmem [shape: bf16[256,128], index: 3, kind: input, shape index: {}]   ;;  %s2084_s4 = inlined_call_operand.hbm [shape: f32[1,128], index: 4, kind: input, shape index: {}]   ;;  %s2085_s5 = inlined_call_operand.vmem [shape: bf16[128,64], index: 5, kind: input, shape index: {}]   ;;  %s2086_s6 = inlined_call_operand.hbm [shape: f32[1,64], index: 6, kind: input, shape index: {}]   ;;  %s2087_s7 = inlined_call_operand.vmem [shape: bf16[64,32], index: 7, kind: input, shape index: {}]   ;;  %s2088_s8 = inlined_call_operand.hbm [shape: f32[1,32], index: 8, kind: input, shape index: {}]   ;;  %s2089_s9 = inlined_call_operand.vmem [shape: bf16[32,128], index: 9, kind: input, shape index: {}]   ;;  %s2090_s10 = inlined_call_operand.vmem [shape: f32[1,128], index: 10, kind: input, shape index: {}]   ;;  %s2091_s11 = inlined_call_operand.hbm [shape: f32[16,128], index: 11, kind: output, shape index: {}]  }
   0x1   :  { %2097 = sst [smem:[#allocation16_spill]] %s2081_s1 }
   0x2   :  { %2098 = sst [smem:[#allocation17_spill]] %s2089_s9 }
   0x3   :  { %2099 = sst [smem:[#allocation18_spill]] %s2090_s10 }
   0x4   :  { %2100 = sst [smem:[#allocation19_spill]] %s2091_s11 }
   0x5   :  { %16 = vsyncpa [#allocation3], 0 }
   0x6   :  { %18 = vsyncpa [#allocation3 + $0x1], 0 }
   0x7   :  { %19 = vsyncpa [#allocation6], 0 }
   0x8   :  { %20 = vsyncpa [#allocation9], 0 }
   0x9   :  { %21 = vsyncpa [#allocation4], 0 }
   0xa   :  { %23 = vsyncpa [#allocation4 + $0x1], 0  ;;  %s1676_s17 = smov 0   ;;  %s1678_s18 = smov 0  }
   0xb   :  { %s1680_s19 = smov 0   ;;  %s1682_s20 = smov 0  }
   0xc LB: > { %s1605_s21 = smov [#allocation5]   ;;  %s1697_s23 = sadd.s32 4294967295, %s1603_s20   ;;  %s1603_s20 = sphi %s1682_s20, %s2125_s20   ;;  %s1599_s19 = sphi %s1680_s19, %s2124_s19   ;;  %s1595_s18 = sphi %s1678_s18, %s2123_s18   ;;  %s1591_s17 = sphi %s1676_s17, %s2122_s17  }
   0xd   : > { %s308_s22 = sshll.u32 %s1605_s21, 4  ;;  %p1116_p0 = scmp.ge.s32.totalorder %s1603_s20, 1  ;;  %s1702_s22 = int_to_ptr.vmem [resolvable:$true] %s308_s22 }
   0xe   : > { %p2094_p1 = scmp.eq.s32.totalorder %s1697_s23, 0  ;;  %p296_p2 = scmp.lt.s32.totalorder %s1603_s20, 3 }
   0xf   : > { %s1606_s25 = smov [#allocation8]   ;;  %s1607_s28 = smov [#allocation7]  }
  0x10   : > { %p1704_p3 = pnand %p1116_p0, %p296_p2  ;;  %s342_s26 = sshll.u32 %s1606_s25, 4  ;;  %s1717_s26 = int_to_ptr.vmem [resolvable:$true] %s342_s26 }
  0x11   : > { %s328_s29 = sshll.u32 %s1607_s28, 4  ;;  %s2103_s1 = sld [smem:[#allocation16_spill]]  ;;  %s1719_s29 = int_to_ptr.vmem [resolvable:$true] %s328_s29 }
  0x12   : > { %s2101_s24 = scalar_select %p1704_p3, 1, 0 }
  0x13   : > { %p1275_p5 = pneg %p1704_p3 }
  0x15   : > { %p1713_p6 = pnand %p1275_p5, %p2094_p1 }
  0x17   : > { %s1387_s13 = scalar_lea.hbm %s2103_s1, 512  ;;  %p1729_p8 = pneg %p1713_p6 }
  0x18   : > { %p1388_p7 = scmp.ne.s32.totalorder %s2103_s1, %s1387_s13  ;;  %p1394_p11 = scmp.lt.u32.totalorder %s1387_s13, %s2103_s1 }
  0x1a   : > { %p1390_p9 = pnand %p1729_p8, %p1388_p7 }
  0x1c   : > { %p1391_p10 = pneg %p1390_p9 }
  0x1e   : > { %p1396_p12 = pnand %p1394_p11, %p1391_p10 }
  0x20   : > { %1399 = shalt.err (!%p1396_p12)
}
  0x21   : > { %s1400_s28 = scalar_lea.vmem %s1702_s22, 512  ;;  %p1408_p5 = scmp.lt.s32.totalorder %s1702_s22, %s1702_s22 }
  0x22   : > { %p1401_p13 = scmp.ne.s32.totalorder %s1702_s22, %s1400_s28  ;;  %p1409_p4 = scmp.lt.s32.totalorder %s1400_s28, %s1400_s28 }
  0x24   : > { %p1403_p0 = pnand %p1401_p13, %p1729_p8  ;;  %p1410_p7 = por %p1409_p4, %p1408_p5 }
  0x26   : > { %p1404_p2 = pneg %p1403_p0 }
  0x28   : > { %p1411_p9 = pnand %p1410_p7, %p1404_p2 }
  0x2a   : > { %1414 = shalt.err (!%p1411_p9)
}
  0x2b   : > { %s1608_s30 = smov 128   ;;  %s1609_s12 = smov 8  }
  0x2c   : > { %1278 = dma.hbm_to_vmem [thread:$0]  (!%p1713_p6), %s2103_s1, 512, %s1702_s22, [#allocation6], %s1608_s30, %s1608_s30, %s1609_s12  }
  0x2d   : > { %s1415_s25 = scalar_lea.hbm %s2086_s6, 16 }
  0x2e   : > { %p1416_p4 = scmp.ne.s32.totalorder %s2086_s6, %s1415_s25  ;;  %p1422_p12 = scmp.lt.u32.totalorder %s1415_s25, %s2086_s6 }
  0x30   : > { %p1418_p10 = pnand %p1416_p4, %p1729_p8 }
  0x32   : > { %p1419_p11 = pneg %p1418_p10 }
  0x34   : > { %p1424_p13 = pnand %p1422_p12, %p1419_p11 }
  0x36   : > { %1427 = shalt.err (!%p1424_p13)
}
  0x37   : > { %s1428_s22 = scalar_lea.vmem %s1717_s26, 16  ;;  %s1435_s10 = scalar_lea.vmem %s1717_s26, 32 }
  0x38   : > { %p1429_p0 = scmp.ne.s32.totalorder %s1717_s26, %s1428_s22  ;;  %p1436_p7 = scmp.lt.s32.totalorder %s1717_s26, %s1717_s26 }
  0x39   : > { %p1437_p9 = scmp.lt.s32.totalorder %s1435_s10, %s1428_s22 }
  0x3a   : > { %p1431_p2 = pnand %p1429_p0, %p1729_p8 }
  0x3b   : > { %p1438_p4 = por %p1437_p9, %p1436_p7 }
  0x3c   : > { %p1432_p5 = pneg %p1431_p2 }
  0x3e   : > { %p1439_p10 = pnand %p1438_p4, %p1432_p5 }
  0x40   : > { %1442 = shalt.err (!%p1439_p10)
}
  0x41   : > { %1284 = dma.hbm_to_vmem [thread:$0]  (!%p1713_p6), %s2086_s6, 16, %s1717_s26, [#allocation9]  }
  0x42   : > { %s1443_s13 = scalar_lea.hbm %s2084_s4, 16 }
  0x43   : > { %p1444_p11 = scmp.ne.s32.totalorder %s2084_s4, %s1443_s13  ;;  %p1450_p0 = scmp.lt.u32.totalorder %s1443_s13, %s2084_s4 }
  0x45   : > { %p1446_p12 = pnand %p1444_p11, %p1729_p8 }
  0x47   : > { %p1447_p13 = pneg %p1446_p12 }
  0x49   : > { %p1452_p2 = pnand %p1450_p0, %p1447_p13 }
  0x4b   : > { %1455 = shalt.err (!%p1452_p2)
}
  0x4c   : > { %s1456_s26 = scalar_lea.vmem %s1719_s29, 16  ;;  %s1463_s28 = scalar_lea.vmem %s1719_s29, 32 }
  0x4d   : > { %p1457_p5 = scmp.ne.s32.totalorder %s1719_s29, %s1456_s26  ;;  %p1464_p4 = scmp.lt.s32.totalorder %s1719_s29, %s1719_s29 }
  0x4e   : > { %p1465_p10 = scmp.lt.s32.totalorder %s1463_s28, %s1456_s26 }
  0x4f   : > { %p1459_p7 = pnand %p1457_p5, %p1729_p8 }
  0x50   : > { %p1466_p11 = por %p1465_p10, %p1464_p4 }
  0x51   : > { %p1460_p9 = pneg %p1459_p7 }
  0x53   : > { %p1467_p12 = pnand %p1466_p11, %p1460_p9 }
  0x55   : > { %1470 = shalt.err (!%p1467_p12)
}
  0x56   : > { %1281 = dma.hbm_to_vmem [thread:$0]  (!%p1713_p6), %s2084_s4, 16, %s1719_s29, [#allocation6]  }
  0x57   : > { %s1610_s9 = smov [#allocation10]   ;;  %s1471_s13 = scalar_lea.hbm %s2088_s8, 16 }
  0x58   : > { %s356_s11 = sshll.u32 %s1610_s9, 4  ;;  %p1472_p13 = scmp.ne.s32.totalorder %s2088_s8, %s1471_s13  ;;  %s357_s11 = int_to_ptr.vmem [resolvable:$true] %s356_s11 }
  0x59   : > { %p1478_p5 = scmp.lt.u32.totalorder %s1471_s13, %s2088_s8 }
  0x5a   : > { %p1474_p0 = pnand %p1472_p13, %p1729_p8 }
  0x5c   : > { %p1475_p2 = pneg %p1474_p0 }
  0x5e   : > { %p1480_p7 = pnand %p1478_p5, %p1475_p2 }
  0x60   : > { %1483 = shalt.err (!%p1480_p7)
}
  0x61   : > { %s1484_s29 = scalar_lea.vmem %s357_s11, 16  ;;  %s1491_s26 = scalar_lea.vmem %s357_s11, 32 }
  0x62   : > { %p1485_p9 = scmp.ne.s32.totalorder %s357_s11, %s1484_s29  ;;  %p1492_p11 = scmp.lt.s32.totalorder %s357_s11, %s357_s11 }
  0x63   : > { %p1493_p12 = scmp.lt.s32.totalorder %s1491_s26, %s1484_s29 }
  0x64   : > { %p1487_p4 = pnand %p1485_p9, %p1729_p8 }
  0x65   : > { %p1494_p1 = por %p1493_p12, %p1492_p11 }
  0x66   : > { %p1488_p10 = pneg %p1487_p4 }
  0x68   : > { %p1495_p3 = pnand %p1494_p1, %p1488_p10 }
  0x6a   : > { %1498 = shalt.err (!%p1495_p3)
}
  0x6b   : > { %1287 = dma.hbm_to_vmem [thread:$0]  (!%p1713_p6), %s2088_s8, 16, %s357_s11, [#allocation9]  }
  0x6c   : > { %s1115_s16 = sadd.s32 4294967294, %s1603_s20   ;;  %s1818_s27 = sadd.s32 1, %s1603_s20  }
  0x6d   : > { %s33_s10 = ssub.s32 %s1603_s20, %s1818_s27  ;;  %s36_s9 = sadd.s32 1, %s1599_s19 }
  0x6e   : > { %p34_p1 = scmp.eq.s32.totalorder %s33_s10, 0  ;;  %p43_p3 = scmp.ne.s32.totalorder %s1599_s19, %s1595_s18 }
  0x6f   : > { %p44_p8 = scmp.eq.s32.totalorder %s1603_s20, 0  ;;  %p49_p13 = scmp.ne.s32.totalorder %s1595_s18, %s1591_s17 }
  0x70   : > { %s1829_s30 = scalar_select %p34_p1, %s1599_s19, %s36_s9  }
  0x71   : > { %p1831_p0 = por %p44_p8, %p43_p3  ;;  %p2106_p2 = scmp.eq.s32.totalorder %s1697_s23, 0 }
  0x72   : > { %p283_p5 = scmp.eq.s32.totalorder %s1697_s23, 1  ;;  %p289_p7 = scmp.eq.s32.totalorder %s1115_s16, 1 }
  0x73   : > { %p1837_p6 = por %p2106_p2, %p49_p13  ;;  %p1300_p9 = scmp.lt.s32.totalorder %s1603_s20, 2 }
  0x74   : > { %s373_s13 = sand.u32 1, %s1599_s19   ;;  %p1844_p4 = por %p283_p5, %p43_p3 }
  0x75   : > { %p1848_p10 = por %p289_p7, %p49_p13  ;;  %s1122_s21 = sshll.u32 %s373_s13, 3 }
  0x76   : > { %s2108_s14 = scalar_select %p1844_p4, 1, 0 }
  0x77   : > { %s2109_s15 = scalar_select %p1848_p10, 1, 0 }
  0x78   : > { %s1123_s25 = sshll.u32 %s1603_s20, 7  ;;  %s377_s22 = scalar_lea.vmem [#allocation2], %s1122_s21 }
  0x79   : > { %s1856_s28 = scalar_lea.hbm %s2080_s0, %s1123_s25  ;;  %s384_s16 = sshll.u32 %s377_s22, 4  ;;  %s1858_s16 = int_to_ptr.vmem [resolvable:$true] %s384_s16 }
  0x7a   : > { %p1862_p11 = pnand %p1300_p9, %p1831_p0  ;;  %s374_s9 = scalar_lea.sflag [#allocation3], %s373_s13 }
  0x7b   : > { %s1499_s1 = scalar_lea.hbm %s1856_s28, 128  ;;  %s1504_s29 = scalar_lea.hbm %s2080_s0, 256 }
  0x7c   : > { %p1500_p12 = scmp.ne.s32.totalorder %s1856_s28, %s1499_s1  ;;  %p1501_p1 = pneg %p1862_p11 }
  0x7d   : > { %p1505_p13 = scmp.lt.u32.totalorder %s1856_s28, %s2080_s0  ;;  %p1506_p0 = scmp.lt.u32.totalorder %s1504_s29, %s1499_s1 }
  0x7e   : > { %p1502_p3 = pnand %p1501_p1, %p1500_p12  ;;  %p1508_p5 = scmp.lt.u32.totalorder %s1499_s1, %s1856_s28 }
  0x7f   : > { %p1507_p2 = por %p1506_p0, %p1505_p13 }
  0x80   : > { %p1503_p8 = pneg %p1502_p3 }
  0x81   : > { %p1509_p7 = por %p1508_p5, %p1507_p2 }
  0x83   : > { %p1510_p9 = pnand %p1509_p7, %p1503_p8 }
  0x85   : > { %1513 = shalt.err (!%p1510_p9)
}
  0x86   : > { %s1514_s13 = scalar_lea.vmem %s1858_s16, 128  ;;  %s1611_s22 = smov [#allocation2]  }
  0x87   : > { %p1515_p12 = scmp.ne.s32.totalorder %s1858_s16, %s1514_s13  ;;  %s1519_s21 = sshll.u32 %s1611_s22, 4  ;;  %s1520_s21 = int_to_ptr.vmem [resolvable:$false] %s1519_s21 }
  0x88   : > { %s1521_s25 = scalar_lea.vmem %s1520_s21, 256  ;;  %p1522_p4 = scmp.lt.s32.totalorder %s1858_s16, %s1520_s21 }
  0x89   : > { %p1517_p3 = pnand %p1515_p12, %p1501_p1  ;;  %p1523_p13 = scmp.lt.s32.totalorder %s1521_s25, %s1514_s13 }
  0x8b   : > { %p1518_p10 = pneg %p1517_p3  ;;  %p1524_p0 = por %p1523_p13, %p1522_p4 }
  0x8d   : > { %p1525_p2 = pnand %p1524_p0, %p1518_p10 }
  0x8f   : > { %1528 = shalt.err (!%p1525_p2)
}
  0x90   : > { %1291 = dma.hbm_to_vmem [thread:$0]  (!%p1862_p11), %s1856_s28, 128, %s1858_s16, %s374_s9  }
  0x91   : > { %p2111_p8 = scmp.ne.s32.totalorder %s2101_s24, 0 }
  0x92   : > { %s1894_s1 = sand.u32 (!%p2111_p8), 1, %s1595_s18  }
  0x93   : > { %393 = sbr.rel (%p2111_p8) target bundleno = 1587 (0x633), region = 64  ;;  %s1125_s29 = sshll.u32 (!%p2111_p8), %s1894_s1, 3 }
  0x94   : > { %s396_s12 = scalar_lea.sflag (!%p2111_p8), [#allocation3], %s1894_s1  ;;  %s399_s26 = scalar_lea.vmem (!%p2111_p8), [#allocation2], %s1125_s29 }
  0x9a   : > { %1574 = dma.done.wait (%p1837_p6), %s396_s12, 128  }
  0x9b   : > { %1576 = vsyncadd (%p1837_p6), %s396_s12, 4294967168  ;;  %p2112_p4 = scmp.eq.s32.totalorder %s1697_s23, 0 }
  0x9d   : > { %1578 = dma.done.wait (%p2112_p4), [#allocation6], 528   ;;  %p2113_p10 = pmov %p2112_p4 }
  0x9e   : > { %p2114_p11 = pmov %p2112_p4 }
  0x9f   : > { %1580 = vsyncadd (%p2113_p10), [#allocation6], 4294966768 }
  0xa0   : > { %1582 = dma.done.wait (%p2114_p11), [#allocation9], 32   ;;  %p2115_p1 = pmov %p2112_p4 }
  0xa1   : > { %v1612_v0 = vmov 0   ;;  %v1347_v1 = vld [vmem:[#allocation5 + $0x4] ss:$8 sps:$4 sm:$0xff]   ;;  %v1349_v2 = vld [vmem:[#allocation5] ss:$8 sps:$4 sm:$0xff]   ;;  %v455_v5 = vld [vmem:[%s399_s26] sm:$0xff]  ;;  %v463_v30 = vlaneseq }
  0xa2   : > { %1584 = vsyncadd (%p2115_p1), [#allocation9], 4294967264  ;;  %529 = vmatprep.mubr.bf16.mxu0 %v1612_v0  ;;  %497 = vmatprep.subr.bf16.mxu0 %v1347_v1  ;;  %v1350_v3 = vld [vmem:[#allocation5 + $0x14] ss:$8 sps:$4 sm:$0xff]   ;;  %v1352_v4 = vld [vmem:[#allocation5 + $0x10] ss:$8 sps:$4 sm:$0xff]   ;;  %v456_v9 = vpack.c.bf16 %v455_v5, %v455_v5 }
  0xa3   : > { %498 = vmatpush1.bf16.msra.mxu0 %v1349_v2  ;;  %v1353_v6 = vld [vmem:[%s2083_s3 + $0x40] sm:$0xff]   ;;  %v1355_v8 = vld [vmem:[%s2083_s3 + $0x48] sm:$0xff]   ;;  %vm493_vm0 = vcmask 261120   ;;  %v1357_v11 = vld [vmem:[%s2083_s3 + $0x50] sm:$0xff]   ;;  %v1613_v24 = vmov 0.0   ;;  %v464_v31 = vshrl.u32 %v463_v30, 7 }
  0xa4   : > { %499 = vmatprep.subr.bf16.mxu0 %v1350_v3  ;;  %v1354_v7 = vld [vmem:[%s2083_s3] sm:$0xff]   ;;  %1176 = vmatprep.subr.bf16.mxu1 %v1353_v6  ;;  %v1356_v10 = vld [vmem:[%s2083_s3 + $0x8] sm:$0xff]   ;;  %v1358_v12 = vld [vmem:[%s2083_s3 + $0x10] sm:$0xff]   ;;  %vm1614_vm1 = vmmov 0   ;;  %s2116_s24 = sld [smem:[#allocation17_spill]]  ;;  %vm871_vm2 = vcmask 523264  }
  0xa5   : > { %1177 = vmatpush3.bf16.msra.mxu1 %v1354_v7  ;;  %v1359_v13 = vld [vmem:[%s2083_s3 + $0x58] sm:$0xff]   ;;  %v1361_v15 = vld [vmem:[%s2083_s3 + $0x60] sm:$0xff]   ;;  %v1363_v17 = vld [vmem:[%s2083_s3 + $0x68] sm:$0xff]   ;;  %v465_v32 = vsub.s32 0, %v464_v31  ;;  %v469_v34 = vsub.s32 1, %v464_v31  ;;  %s2117_s9 = sld [smem:[#allocation18_spill]] }
  0xa6   : > { %1178 = vmatprep.subr.bf16.mxu1 %v1355_v8  ;;  %v1360_v14 = vld [vmem:[%s2083_s3 + $0x18] sm:$0xff]   ;;  %v1362_v16 = vld [vmem:[%s2083_s3 + $0x20] sm:$0xff]   ;;  %v1364_v18 = vld [vmem:[%s2083_s3 + $0x28] sm:$0xff]   ;;  %s1173_s13 = sshll.u32 %s1697_s23, 7  ;;  %s453_s22 = scalar_lea.vmem [#allocation11], %s1125_s29 }
  0xa7   : > { %500 = vmatpush1.bf16.msra.mxu0 %v1352_v4  ;;  %v1365_v19 = vld [vmem:[%s2083_s3 + $0x70] sm:$0xff]   ;;  %v1367_v21 = vld [vmem:[%s2083_s3 + $0x78] sm:$0xff]   ;;  %v1369_v23 = vld [vmem:[%s2085_s5] sm:$0xff]   ;;  %s1007_s21 = sshll.u32 %s453_s22, 4  ;;  %s2118_s26 = sld [smem:[#allocation19_spill]]  ;;  %s2038_s21 = int_to_ptr.vmem [resolvable:$true] %s1007_s21 }
  0xa8   : > { %v1366_v20 = vld [vmem:[%s2083_s3 + $0x30] sm:$0xff]   ;;  %v1368_v22 = vld [vmem:[%s2083_s3 + $0x38] sm:$0xff]   ;;  %1215 = vmatprep.subr.bf16.mxu0 %v1613_v24  ;;  %v1370_v25 = vld [vmem:[%s2085_s5 + $0x8] sm:$0xff]   ;;  %s994_s28 = scalar_lea.sflag [#allocation4], %s1894_s1  ;;  %s1529_s16 = scalar_lea.vmem %s2038_s21, 128 }
  0xa9   : > { %1179 = vmatpush3.bf16.msra.mxu1 %v1356_v10  ;;  %v1371_v26 = vld [vmem:[%s2085_s5 + $0x10] sm:$0xff]   ;;  %v1372_v27 = vld [vmem:[%s2085_s5 + $0x18] sm:$0xff]   ;;  %v1373_v28 = vld [vmem:[%s2085_s5 + $0x20] sm:$0xff]   ;;  %p1530_p6 = scmp.ne.s32.totalorder %s2038_s21, %s1529_s16  ;;  %p2119_p5 = scmp.ne.s32.totalorder %s2108_s14, 0 }
  0xaa   : > { %1135 = vmatmul.mubr.msk.bf16.vlgmr.msra.gmra.mrb[0].mxu0 %vm493_vm0, %v456_v9  ;;  %1180 = vmatprep.subr.bf16.mxu1 %v1357_v11  ;;  %v1374_v29 = vld [vmem:[%s2085_s5 + $0x28] sm:$0xff]   ;;  %v461_v33 = vld [vmem:[%s2082_s2] sm:$0x3]  ;;  %v1375_v47 = vld [vmem:[%s2085_s5 + $0x30] sm:$0xff]   ;;  %s1615_s23 = smov [#allocation11]  }
  0xab   : > { %1216 = vmatpush3.bf16.msra.mxu0 %v1369_v23  ;;  %v466_v35 = vrot.slane %v461_v33, %v465_v32  ;;  %v470_v36 = vrot.slane %v461_v33, %v469_v34  ;;  %v1376_v48 = vld [vmem:[%s2085_s5 + $0x38] sm:$0xff]   ;;  %1231 = vmatprep.mubr.msk.bf16.mxu0 %vm1614_vm1, %v1613_v24  ;;  %v1377_v49 = vld [vmem:[%s2087_s7] sm:$0xff]   ;;  %v1378_v50 = vld [vmem:[%s2087_s7 + $0x8] sm:$0xff]   ;;  %p1531_p7 = pnand %p1530_p6, %p2119_p5  ;;  %s1533_s29 = sshll.u32 %s1615_s23, 4  ;;  %s1534_s29 = int_to_ptr.vmem [resolvable:$false] %s1533_s29 }
  0xac   : > { %1217 = vmatprep.subr.bf16.mxu0 %v1613_v24  ;;  %v1136_v52 = vld [vmem:[#allocation7] ss:$0 sm:$0xff]  ;;  %v1380_v61 = vld [vmem:[%s2087_s7 + $0x18] sm:$0xff]   ;;  %v1381_v62 = vld [vmem:[%s2116_s24] sm:$0xff]   ;;  %s1535_s10 = scalar_lea.vmem %s1534_s29, 256  ;;  %p1536_p12 = scmp.lt.s32.totalorder %s2038_s21, %s1534_s29 }
  0xad   : > { %1181 = vmatpush3.bf16.msra.mxu1 %v1358_v12  ;;  %v1379_v60 = vld [vmem:[%s2087_s7 + $0x10] sm:$0xff]   ;;  %v1382_v7 = vld [vmem:[%s2116_s24 + $0x8] sm:$0xff]   ;;  %s2036_s11 = scalar_lea.hbm %s2118_s26, %s1173_s13  ;;  %p1532_p9 = pneg %p1531_p7 }
  0xae   : > { %1182 = vmatprep.subr.bf16.mxu1 %v1359_v13  ;;  %v1153_v63 = vld [vmem:[#allocation8] ss:$0 sm:$0xff]  ;;  %v1162_v8 = vld [vmem:[#allocation10] ss:$0 sm:$0xff]  ;;  %p1537_p3 = scmp.lt.s32.totalorder %s1535_s10, %s1529_s16 }
  0xaf   : > { %1218 = vmatpush3.bf16.msra.mxu0 %v1370_v25 }
  0xb0   : > { %1219 = vmatprep.subr.bf16.mxu0 %v1613_v24  ;;  %p1538_p13 = por %p1537_p3, %p1536_p12 }
  0xb1   : > { %1183 = vmatpush3.bf16.msra.mxu1 %v1360_v14 }
  0xb2   : > { %1184 = vmatprep.subr.bf16.mxu1 %v1361_v15  ;;  %p1539_p0 = pnand %p1538_p13, %p1532_p9 }
  0xb3   : > { %1220 = vmatpush3.bf16.msra.mxu0 %v1371_v26 }
  0xb4   : > { %1221 = vmatprep.subr.bf16.mxu0 %v1613_v24 }
  0xb5   : > { %1185 = vmatpush3.bf16.msra.mxu1 %v1362_v16  ;;  %v1168_v16 = vld [vmem:[%s2117_s9] ss:$0 sm:$0xff] }
  0xb6   : > { %1186 = vmatprep.subr.bf16.mxu1 %v1363_v17 }
  0xb7   : > { %1222 = vmatpush3.bf16.msra.mxu0 %v1372_v27 }
  0xb8   : > { %1223 = vmatprep.subr.bf16.mxu0 %v1613_v24 }
  0xb9   : > { %1187 = vmatpush3.bf16.msra.mxu1 %v1364_v18 }
  0xba   : > { %1188 = vmatprep.subr.bf16.mxu1 %v1365_v19 }
  0xbb   : > { %1224 = vmatpush3.bf16.msra.mxu0 %v1373_v28 }
  0xbc   : > { %1225 = vmatprep.subr.bf16.mxu0 %v1613_v24 }
  0xbd   : > { %1189 = vmatpush3.bf16.msra.mxu1 %v1366_v20 }
  0xbe   : > { %1190 = vmatprep.subr.bf16.mxu1 %v1367_v21 }
  0xbf   : > { %1226 = vmatpush3.bf16.msra.mxu0 %v1374_v29 }
  0xc0   : > { %1227 = vmatprep.subr.bf16.mxu0 %v1613_v24 }
  0xc1   : > { %1191 = vmatpush3.bf16.msra.mxu1 %v1368_v22 }
  0xc2   : > { %1235 = vmatprep.subr.bf16.mxu1 %v1613_v24 }
  0xc3   : > { %1228 = vmatpush3.bf16.msra.mxu0 %v1375_v47 }
  0xc4   : > { %1229 = vmatprep.subr.bf16.mxu0 %v1613_v24 }
  0xc7   : > { %1230 = vmatpush3.bf16.msra.mxu0 %v1376_v48 }
  0xc8   : > { %1247 = vmatprep.subr.bf16.mxu0 %v1613_v24 }
 0x17d   : > { %v531_v37 = vpop.f32.mrb[0].mxu0 }
 0x17e   : > { %v532_v38 = vadd.f32 %v531_v37, %v466_v35  ;;  %v533_v39 = vpop.f32.mrb[1].mxu0 }
 0x17f   : > { %v534_v40 = vadd.f32 %v533_v39, %v470_v36  ;;  %v535_v41 = vpop.f32.mrb[2].mxu0 }
 0x180   : > { %v538_v42 = vmax.f32 %v532_v38, 0.0  ;;  %v536_v43 = vpop.f32.mrb[3].mxu0 }
 0x181   : > { %v539_v44 = vmax.f32 %v534_v40, 0.0 }
 0x182   : > { %v540_v46 = vpack.c.bf16 %v538_v42, %v538_v42 }
 0x183   : > { %v541_v45 = vpack.c.bf16 %v539_v44, %v539_v44 }
 0x185   : > { %709 = vmatprep.mubr.bf16.mxu1 %v541_v45 }
 0x186   : > { %710 = vmatmul.mubr.bf16.vlgmr.msra.gmra.mrb[0].mxu1 %v540_v46 }
 0x187   : > { %1243 = vmatprep.mubr.msk.bf16.mxu1 %vm1614_vm1, %v1613_v24  ;;  %1236 = vmatpush3.bf16.msra.mxu1 %v1377_v49 }
 0x188   : > { %1237 = vmatprep.subr.bf16.mxu1 %v1613_v24 }
 0x18b   : > { %1238 = vmatpush3.bf16.msra.mxu1 %v1378_v50 }
 0x18c   : > { %1239 = vmatprep.subr.bf16.mxu1 %v1613_v24 }
 0x18f   : > { %1240 = vmatpush3.bf16.msra.mxu1 %v1379_v60 }
 0x190   : > { %1241 = vmatprep.subr.bf16.mxu1 %v1613_v24 }
 0x193   : > { %1242 = vmatpush3.bf16.msra.mxu1 %v1380_v61 }
 0x259   : > { %v1192_v51 = vpop.f32.mrb[0].mxu1 }
 0x25a   : > { %v1193_v53 = vpop.f32.mrb[1].mxu1 }
 0x25b   : > { %v1194_v54 = vadd.f32 %v1193_v53, %v1192_v51  ;;  %v1195_v55 = vpop.f32.mrb[2].mxu1 }
 0x25c   : > { %v1196_v56 = vpop.f32.mrb[3].mxu1 }
 0x25d   : > { %v712_v57 = vadd.f32 %v1194_v54, %v1136_v52 }
 0x25f   : > { %v717_v58 = vmax.f32 %v712_v57, 0.0 }
 0x261   : > { %v718_v59 = vpack.c.bf16 %v717_v58, %v717_v58 }
 0x263   : > { %1232 = vmatmul.mubr.bf16.vlgmr.msra.gmra.mrb[4].mxu0 %v718_v59 }
 0x264   : > { %1251 = vmatprep.mubr.msk.bf16.mxu0 %vm1614_vm1, %v1613_v24  ;;  %1248 = vmatpush3.bf16.msra.mxu0 %v1381_v62 }
 0x265   : > { %1249 = vmatprep.subr.bf16.mxu0 %v1613_v24 }
 0x268   : > { %1250 = vmatpush3.bf16.msra.mxu0 %v1382_v7 }
 0x336   : > { %v824_v0 = vpop.f32.mrb[4].mxu0 }
 0x337   : > { %v825_v1 = vadd.f32 %v1153_v63, %v824_v0  ;;  %v1233_v2 = vpop.f32.mrb[5].mxu0 }
 0x338   : > { %v827_v3 = vpop.f32.mrb[6].mxu0 }
 0x339   : > { %v830_v4 = vmax.f32 %v825_v1, 0.0  ;;  %v1234_v5 = vpop.f32.mrb[7].mxu0 }
 0x33b   : > { %v831_v6 = vpack.c.bf16 %v830_v4, %v830_v4 }
 0x33d   : > { %1244 = vmatmul.mubr.msk.bf16.vlgmr.msra.gmra.mrb[4].mxu1 %vm871_vm2, %v831_v6 }
 0x410   : > { %v909_v9 = vpop.f32.mrb[4].mxu1 }
 0x411   : > { %v910_v10 = vadd.f32 %v1162_v8, %v909_v9  ;;  %v1245_v11 = vpop.f32.mrb[5].mxu1 }
 0x412   : > { %v912_v12 = vpop.f32.mrb[6].mxu1 }
 0x413   : > { %v915_v13 = vmax.f32 %v910_v10, 0.0  ;;  %v1246_v14 = vpop.f32.mrb[7].mxu1 }
 0x415   : > { %v916_v15 = vpack.c.bf16 %v915_v13, %v915_v13 }
 0x417   : > { %1252 = vmatmul.mubr.msk.bf16.vlgmr.msra.gmra.mrb[8].mxu0 %vm493_vm0, %v916_v15 }
 0x4ea   : > { %v977_v17 = vpop.f32.mrb[8].mxu0 }
 0x4eb   : > { %v978_v18 = vadd.f32 %v1168_v16, %v977_v17  ;;  %v1253_v19 = vpop.f32.mrb[9].mxu0 }
 0x4ec   : > { %v980_v20 = vpop.f32.mrb[10].mxu0 }
 0x4ed   : > { %983 = vmax.xlane.f32.xlu0 %v978_v18  ;;  %v1254_v21 = vpop.f32.mrb[11].mxu0 }
 0x57a   : > { %v984_v22 = vpop.xlane.xlu0 %983 }
 0x57b   : > { %v985_v23 = vsub.f32 %v978_v18, %v984_v22 }
 0x57d   : > { %v986_v24 = vmul.f32 1.442695, %v985_v23 }
 0x57f   : > { %1383 = vpow2.f32 %v986_v24 }
 0x589   : > { %v1384_v25 = vpop.eup %1383 }
 0x58a   : > { %988 = vadd.xlane.f32.xlu0 %v1384_v25 }
 0x617   : > { %v989_v26 = vpop.xlane.xlu0 %988 }
 0x618   : > { %1385 = vrcp.f32 %v989_v26 }
 0x622   : > { %v1386_v27 = vpop.eup %1385 }
 0x623   : > { %v991_v28 = vmul.f32 %v1386_v27, %v1384_v25 }
 0x625   : > { %992 = vst [vmem:[%s453_s22] sm:$0xff] %v991_v28 }
 0x626   : > { %1542 = shalt.err (!%p1539_p0)
}
 0x627   : > { %s1543_s1 = scalar_lea.hbm %s2036_s11, 128  ;;  %s1547_s22 = scalar_lea.hbm %s2118_s26, 256 }
 0x628   : > { %p1544_p2 = scmp.ne.s32.totalorder %s2036_s11, %s1543_s1  ;;  %p1548_p10 = scmp.lt.u32.totalorder %s2036_s11, %s2118_s26 }
 0x629   : > { %p1549_p11 = scmp.lt.u32.totalorder %s1547_s22, %s1543_s1  ;;  %p1551_p6 = scmp.lt.u32.totalorder %s1543_s1, %s2036_s11 }
 0x62a   : > { %p1545_p8 = pnand %p1544_p2, %p2119_p5 }
 0x62b   : > { %p1550_p1 = por %p1549_p11, %p1548_p10 }
 0x62c   : > { %p1546_p4 = pneg %p1545_p8 }
 0x62d   : > { %p1552_p7 = por %p1551_p6, %p1550_p1 }
 0x62f   : > { %p1553_p9 = pnand %p1552_p7, %p1546_p4 }
 0x631   : > { %1556 = shalt.err (!%p1553_p9)
}
 0x632   : > { %1273 = dma.vmem_to_hbm [thread:$0]  (%p2119_p5), %s2038_s21, 128, %s2036_s11, %s994_s28  }
 0x633 PF: > { %s1019_s16 = sand.u32 1, %s1591_s17   ;;  %p2120_p12 = scmp.ne.s32.totalorder %s2109_s15, 0 }
 0x634   : > { %p2121_p3 = scmp.ge.s32.totalorder %s1603_s20, 2  ;;  %s1020_s23 = scalar_lea.sflag [#allocation4], %s1019_s16 }
 0x636   : > { %p1293_p13 = pnand %p2121_p3, %p2120_p12 }
 0x638   : > { %1586 = dma.done.wait (!%p1293_p13), %s1020_s23, 128  }
 0x639   : > { %1588 = vsyncadd (!%p1293_p13), %s1020_s23, 4294967168  ;;  %p26_p0 = scmp.ge.s32.totalorder %s1818_s27, 4   ;;  %s2122_s17 = smov %s1595_s18 }
 0x63a   : > { %s2123_s18 = smov %s1599_s19  ;;  %s2124_s19 = smov %s1829_s30 }
 0x63b   : > { %s2125_s20 = smov %s1818_s27  ;;  %28 = sbr.rel (!%p26_p0) target bundleno = 12 (0xc), region = 125 }
 0x642   :  { %1025 = vsyncpa [#allocation3], 1 }
 0x643   :  { %1027 = vsyncpa [#allocation3 + $0x1], 1 }
 0x644   :  { %1028 = vsyncpa [#allocation6], 1 }
 0x645   :  { %1029 = vsyncpa [#allocation9], 1 }
 0x646   :  { %1030 = vsyncpa [#allocation4], 1 }
 0x647   :  { %1032 = vsyncpa [#allocation4 + $0x1], 1 }

</bundles_post_ra>
